<compile_context>
chip_gen: v7x
topology: tpu7x:2x2x1
jax: 0.10.0
libtpu: 0.0.40
codegen_flags: <defaults>
</compile_context>

<pallas_src>
import functools

import jax
import jax.numpy as jnp
from jax.experimental import pallas as pl
from jax.experimental.pallas import tpu as pltpu


def _cross_modal_kernel(compute_dtype,
                        img_ref, txt_ref,
                        w_ref, b_ref, wd_ref, bd_ref,
                        img_out_ref, txt_out_ref, wimg_out_ref):
    img = img_ref[...]                                   # [TB, Di] f32
    txt = txt_ref[...]                                   # [TB, Dt] f32

    # Lane-wise concat in VMEM/vregs (no extra HBM traffic): [TB, Di+Dt].
    x = jnp.concatenate([img, txt], axis=-1)

    # Single fused block-diagonal projection + bias + tanh.
    #   w_ref = [[Wi, 0], [0, Wt]]  (pre-transposed, [Di+Dt, Di+Dt])
    # MXU matmul in compute_dtype (bf16 on all generations) with f32
    # accumulation; tanh and everything downstream stays f32 (v5e VPU/EUP
    # have no bf16 datapath).
    attn = jnp.tanh(
        jnp.dot(x.astype(compute_dtype), w_ref[...],
                preferred_element_type=jnp.float32) + b_ref[...])   # [TB, Di+Dt]

    # 'concatenate' fusion + Linear(2*min_dim -> 2) + 2-way softmax collapses
    # exactly to sigmoid(logit0 - logit1).  wd_ref holds (wc[:,0]-wc[:,1])
    # scattered onto the fused lane layout (zeros on lanes past min_dim), so
    # the logit difference is one VPU multiply + one XLU cross-lane reduce.
    delta = jnp.sum(attn * wd_ref[...], axis=-1, keepdims=True) + bd_ref[...]

    w_img = jax.nn.sigmoid(delta)                        # == softmax(...)[:, 0:1]
    w_txt = 1.0 - w_img                                  # == softmax(...)[:, 1:2]

    img_out_ref[...] = img * w_img
    txt_out_ref[...] = txt * w_txt
    wimg_out_ref[...] = w_img                            # [TB, 1]; w_txt derived outside


def _round_up(x, m):
    return ((x + m - 1) // m) * m


def cross_modal_attention(image_emb, text_emb, params, *,
                          use_bf16=True, batch_tile=1024):
    """Full CrossModalAttention forward in a single batch-tiled Pallas kernel.

    image_emb: [B, Di], text_emb: [B, Dt].
    Returns (attended_image [B, Di], attended_text [B, Dt], attn_weights [B, 2]).
    """
    if image_emb.ndim == 1:
        image_emb = image_emb[None, :]
    if text_emb.ndim == 1:
        text_emb = text_emb[None, :]
    image_emb = image_emb.astype(jnp.float32)
    text_emb = text_emb.astype(jnp.float32)

    B, Di = image_emb.shape
    _, Dt = text_emb.shape
    min_dim = min(Di, Dt)
    D = Di + Dt

    compute_dtype = jnp.bfloat16 if use_bf16 else jnp.float32

    wi = params["wi"].astype(jnp.float32)
    wt = params["wt"].astype(jnp.float32)
    bi = params["bi"].astype(jnp.float32)
    bt = params["bt"].astype(jnp.float32)
    wc = params["wc"].astype(jnp.float32)
    bc = params["bc"].astype(jnp.float32)

    # Fused block-diagonal projection weight (MXU dtype) + concatenated bias.
    w_blk = jnp.zeros((D, D), jnp.float32)
    w_blk = w_blk.at[:Di, :Di].set(wi)
    w_blk = w_blk.at[Di:, Di:].set(wt)
    w_blk = w_blk.astype(compute_dtype)
    b_cat = jnp.concatenate([bi, bt], axis=-1)                    # [1, D] f32

    # Logit-difference weights for the exact softmax->sigmoid rewrite:
    #   delta = combined @ (wc[:,0]-wc[:,1]) + (bc[0]-bc[1]),
    # scattered onto the fused [Di | Dt] lane layout (zeros past min_dim).
    wd = jnp.zeros((1, D), jnp.float32)
    wd = wd.at[0, :min_dim].set(wc[:min_dim, 0] - wc[:min_dim, 1])
    wd = wd.at[0, Di:Di + min_dim].set(
        wc[min_dim:2 * min_dim, 0] - wc[min_dim:2 * min_dim, 1])
    bd = (bc[0, 0] - bc[0, 1]).reshape(1, 1)

    # Batch tiling: sublane-axis tiles.  Aim for >=4 grid steps when the batch
    # allows it (2 per v7x TensorCore, >=2 per core for pipeline overlap),
    # capped at batch_tile; tiny batches run as one full-batch step.
    if B <= 8:
        tb = B
    else:
        tb = min(batch_tile, max(8, _round_up(pl.cdiv(B, 4), 8)))
        if tb >= B:
            tb = B
    assert tb == B or tb % 8 == 0
    grid = (pl.cdiv(B, tb),)

    def batch_spec(d):
        return pl.BlockSpec((tb, d), lambda i: (i, 0))

    def pinned(r, c):
        # Constant block index -> DMA'd once, stays VMEM-resident across steps.
        return pl.BlockSpec((r, c), lambda i: (0, 0))

    kernel = functools.partial(_cross_modal_kernel, compute_dtype)

    out_img, out_txt, w_img = pl.pallas_call(
        kernel,
        grid=grid,
        out_shape=(
            jax.ShapeDtypeStruct((B, Di), jnp.float32),
            jax.ShapeDtypeStruct((B, Dt), jnp.float32),
            jax.ShapeDtypeStruct((B, 1), jnp.float32),
        ),
        in_specs=[
            batch_spec(Di), batch_spec(Dt),
            pinned(D, D), pinned(1, D), pinned(1, D), pinned(1, 1),
        ],
        out_specs=(batch_spec(Di), batch_spec(Dt), batch_spec(1)),
        compiler_params=pltpu.CompilerParams(
            dimension_semantics=("parallel",),      # shard batch over v7x's 2 TCs
            vmem_limit_bytes=32 * 1024 * 1024),
    )(image_emb, text_emb, w_blk, b_cat, wd, bd)

    attn_weights = jnp.concatenate([w_img, 1.0 - w_img], axis=-1)  # [B, 2]
    return out_img, out_txt, attn_weights


def init_params(key, image_dim, text_dim):
    """Deterministic synthetic parameters (shapes match nn.Linear in __init__).

    Stored pre-transposed as [in_features, out_features]; biases as [1, out]."""
    min_dim = min(image_dim, text_dim)
    combined_dim = 2 * min_dim          # 'concatenate' fusion
    k = jax.random.split(key, 6)
    s = 0.1
    return {
        "wi": s * jax.random.normal(k[0], (image_dim, image_dim), jnp.float32),
        "bi": s * jax.random.normal(k[1], (1, image_dim), jnp.float32),
        "wt": s * jax.random.normal(k[2], (text_dim, text_dim), jnp.float32),
        "bt": s * jax.random.normal(k[3], (1, text_dim), jnp.float32),
        "wc": s * jax.random.normal(k[4], (combined_dim, 2), jnp.float32),
        "bc": s * jax.random.normal(k[5], (1, 2), jnp.float32),
    }


def reference_forward(image_emb, text_emb, params):
    """Pure-JAX reference mirroring the PyTorch forward (eval mode)."""
    hp = jax.lax.Precision.HIGHEST
    img_attn = jnp.tanh(jnp.dot(image_emb, params["wi"], precision=hp)
                        + params["bi"])
    txt_attn = jnp.tanh(jnp.dot(text_emb, params["wt"], precision=hp)
                        + params["bt"])
    min_dim = min(img_attn.shape[-1], txt_attn.shape[-1])
    combined = jnp.concatenate(
        [img_attn[:, :min_dim], txt_attn[:, :min_dim]], axis=-1)
    logits = jnp.dot(combined, params["wc"], precision=hp) + params["bc"]
    w = jax.nn.softmax(logits, axis=-1)
    return image_emb * w[:, 0:1], text_emb * w[:, 1:2], w


if __name__ == "__main__":
    key = jax.random.PRNGKey(0)
    k_img, k_txt, k_param, k_img2, k_txt2 = jax.random.split(key, 5)

    Di, Dt = 48, 32          # image_attention_dim=48, text_attention_dim=32
    params = init_params(k_param, Di, Dt)

    # --- small batch, pure-f32 path (tight tolerance), single grid step -----
    B = 8
    image_emb = jax.random.normal(k_img, (B, Di), jnp.float32)
    text_emb = jax.random.normal(k_txt, (B, Dt), jnp.float32)

    out_img, out_txt, attn_w = cross_modal_attention(
        image_emb, text_emb, params, use_bf16=False)
    jax.block_until_ready((out_img, out_txt, attn_w))

    ref_img, ref_txt, ref_w = reference_forward(image_emb, text_emb, params)
    assert jnp.allclose(out_img, ref_img, atol=1e-4, rtol=1e-4)
    assert jnp.allclose(out_txt, ref_txt, atol=1e-4, rtol=1e-4)
    assert jnp.allclose(attn_w, ref_w, atol=1e-4, rtol=1e-4)

    # --- larger batch, bf16-MXU path, exercises the batch grid (4 x 128) ----
    B2 = 512
    image_emb2 = jax.random.normal(k_img2, (B2, Di), jnp.float32)
    text_emb2 = jax.random.normal(k_txt2, (B2, Dt), jnp.float32)

    out_img2, out_txt2, attn_w2 = cross_modal_attention(
        image_emb2, text_emb2, params, use_bf16=True)
    jax.block_until_ready((out_img2, out_txt2, attn_w2))

    ref_img2, ref_txt2, ref_w2 = reference_forward(image_emb2, text_emb2, params)
    assert jnp.allclose(out_img2, ref_img2, atol=2e-2, rtol=2e-2)
    assert jnp.allclose(out_txt2, ref_txt2, atol=2e-2, rtol=2e-2)
    assert jnp.allclose(attn_w2, ref_w2, atol=2e-2, rtol=2e-2)

    print("KERNEL_OK")
</pallas_src>

<mosaic_0001>
module attributes {stable_mosaic.version = 11 : i64} {
  func.func @_cross_modal_kernel(%arg0: i32, %arg1: memref<8x48xf32, #tpu.memory_space<vmem>>, %arg2: memref<8x32xf32, #tpu.memory_space<vmem>>, %arg3: memref<80x80xf32, #tpu.memory_space<vmem>>, %arg4: memref<1x80xf32, #tpu.memory_space<vmem>>, %arg5: memref<1x80xf32, #tpu.memory_space<vmem>>, %arg6: memref<1x1xf32, #tpu.memory_space<vmem>>, %arg7: memref<8x48xf32, #tpu.memory_space<vmem>>, %arg8: memref<8x32xf32, #tpu.memory_space<vmem>>, %arg9: memref<8x1xf32, #tpu.memory_space<vmem>>) attributes {dimension_semantics = [#tpu.dimension_semantics<parallel>], iteration_bounds = array<i64: 1>, scalar_prefetch = 0 : i64, scratch_operands = 0 : i64, tpu.core_type = #tpu.core_type<tc>, window_params = [{transform_indices = @transform_0, window_bounds = array<i64: 8, 48>}, {transform_indices = @transform_1, window_bounds = array<i64: 8, 32>}, {pipeline_mode = #tpu.pipeline_mode<synchronous>, transform_indices = @transform_2, window_bounds = array<i64: 80, 80>}, {pipeline_mode = #tpu.pipeline_mode<synchronous>, transform_indices = @transform_3, window_bounds = array<i64: 1, 80>}, {pipeline_mode = #tpu.pipeline_mode<synchronous>, transform_indices = @transform_4, window_bounds = array<i64: 1, 80>}, {pipeline_mode = #tpu.pipeline_mode<synchronous>, transform_indices = @transform_5, window_bounds = array<i64: 1, 1>}, {transform_indices = @transform_6, window_bounds = array<i64: 8, 48>}, {transform_indices = @transform_7, window_bounds = array<i64: 8, 32>}, {transform_indices = @transform_8, window_bounds = array<i64: 8, 1>}]} {
    %c0 = arith.constant 0 : index
    %c0_0 = arith.constant 0 : index
    %0 = vector.load %arg1[%c0, %c0_0] : memref<8x48xf32, #tpu.memory_space<vmem>>, vector<8x48xf32>
    %c0_1 = arith.constant 0 : index
    %c0_2 = arith.constant 0 : index
    %1 = vector.load %arg2[%c0_1, %c0_2] : memref<8x32xf32, #tpu.memory_space<vmem>>, vector<8x32xf32>
    %2 = tpu.concatenate %0, %1 in 1 : vector<8x48xf32>, vector<8x32xf32> -> vector<8x80xf32>
    %c0_3 = arith.constant 0 : index
    %c0_4 = arith.constant 0 : index
    %3 = vector.load %arg3[%c0_3, %c0_4] : memref<80x80xf32, #tpu.memory_space<vmem>>, vector<80x80xf32>
    %cst = arith.constant dense<0.000000e+00> : vector<8x80xf32>
    %4 = tpu.matmul %2, %3, %cst {dimension_numbers = #tpu.dot_dimension_numbers<[1], [0], [0], [1], [0, 0, 1, 1], [], []>} : vector<8x80xf32>, vector<80x80xf32>, vector<8x80xf32> -> vector<8x80xf32>
    %c0_5 = arith.constant 0 : index
    %c0_6 = arith.constant 0 : index
    %5 = vector.load %arg4[%c0_5, %c0_6] : memref<1x80xf32, #tpu.memory_space<vmem>>, vector<1x80xf32>
    %6 = vector.broadcast %5 : vector<1x80xf32> to vector<8x80xf32>
    %7 = arith.addf %4, %6 : vector<8x80xf32>
    %8 = math.tanh %7 : vector<8x80xf32>
    %c0_7 = arith.constant 0 : index
    %c0_8 = arith.constant 0 : index
    %9 = vector.load %arg5[%c0_7, %c0_8] : memref<1x80xf32, #tpu.memory_space<vmem>>, vector<1x80xf32>
    %10 = vector.broadcast %9 : vector<1x80xf32> to vector<8x80xf32>
    %11 = arith.mulf %8, %10 : vector<8x80xf32>
    %cst_9 = arith.constant dense<0.000000e+00> : vector<8xf32>
    %12 = vector.multi_reduction <add>, %11, %cst_9 [1] : vector<8x80xf32> to vector<8xf32>
    %13 = vector.shape_cast %12 : vector<8xf32> to vector<8x1xf32>
    %c0_10 = arith.constant 0 : index
    %c0_11 = arith.constant 0 : index
    %14 = vector.load %arg6[%c0_10, %c0_11] : memref<1x1xf32, #tpu.memory_space<vmem>>, vector<1x1xf32>
    %15 = vector.broadcast %14 : vector<1x1xf32> to vector<8x1xf32>
    %16 = arith.addf %13, %15 : vector<8x1xf32>
    %17 = arith.negf %16 : vector<8x1xf32>
    %18 = math.exp %17 : vector<8x1xf32>
    %cst_12 = arith.constant 1.000000e+00 : f32
    %19 = vector.broadcast %cst_12 : f32 to vector<8x1xf32>
    %20 = arith.addf %19, %18 : vector<8x1xf32>
    %21 = arith.divf %19, %20 : vector<8x1xf32>
    %cst_13 = arith.constant 1.000000e+00 : f32
    %22 = vector.broadcast %cst_13 : f32 to vector<8x1xf32>
    %23 = arith.subf %22, %21 : vector<8x1xf32>
    %24 = vector.broadcast %21 : vector<8x1xf32> to vector<8x48xf32>
    %25 = arith.mulf %0, %24 : vector<8x48xf32>
    %c0_14 = arith.constant 0 : index
    %c0_15 = arith.constant 0 : index
    %26 = vector.load %arg7[%c0_14, %c0_15] : memref<8x48xf32, #tpu.memory_space<vmem>>, vector<8x48xf32>
    tpu.vector_store %arg7[%c0_14, %c0_15], %25 {strides = array<i32>} : memref<8x48xf32, #tpu.memory_space<vmem>>, vector<8x48xf32>,
    %27 = vector.broadcast %23 : vector<8x1xf32> to vector<8x32xf32>
    %28 = arith.mulf %1, %27 : vector<8x32xf32>
    %c0_16 = arith.constant 0 : index
    %c0_17 = arith.constant 0 : index
    %29 = vector.load %arg8[%c0_16, %c0_17] : memref<8x32xf32, #tpu.memory_space<vmem>>, vector<8x32xf32>
    tpu.vector_store %arg8[%c0_16, %c0_17], %28 {strides = array<i32>} : memref<8x32xf32, #tpu.memory_space<vmem>>, vector<8x32xf32>,
    %c0_18 = arith.constant 0 : index
    %c0_19 = arith.constant 0 : index
    %30 = vector.load %arg9[%c0_18, %c0_19] : memref<8x1xf32, #tpu.memory_space<vmem>>, vector<8x1xf32>
    tpu.vector_store %arg9[%c0_18, %c0_19], %21 {strides = array<i32>} : memref<8x1xf32, #tpu.memory_space<vmem>>, vector<8x1xf32>,
    return
  }
  func.func @transform_0(%arg0: i32) -> (i32, i32) {
    %c0_i32 = arith.constant 0 : i32
    %c0_i32_0 = arith.constant 0 : i32
    return %arg0, %c0_i32 : i32, i32
  }
  func.func @transform_1(%arg0: i32) -> (i32, i32) {
    %c0_i32 = arith.constant 0 : i32
    %c0_i32_0 = arith.constant 0 : i32
    return %arg0, %c0_i32 : i32, i32
  }
  func.func @transform_2(%arg0: i32) -> (i32, i32) {
    %c0_i32 = arith.constant 0 : i32
    %c0_i32_0 = arith.constant 0 : i32
    %c0_i32_1 = arith.constant 0 : i32
    return %c0_i32, %c0_i32_0 : i32, i32
  }
  func.func @transform_3(%arg0: i32) -> (i32, i32) {
    %c0_i32 = arith.constant 0 : i32
    %c0_i32_0 = arith.constant 0 : i32
    %c0_i32_1 = arith.constant 0 : i32
    return %c0_i32, %c0_i32_0 : i32, i32
  }
  func.func @transform_4(%arg0: i32) -> (i32, i32) {
    %c0_i32 = arith.constant 0 : i32
    %c0_i32_0 = arith.constant 0 : i32
    %c0_i32_1 = arith.constant 0 : i32
    return %c0_i32, %c0_i32_0 : i32, i32
  }
  func.func @transform_5(%arg0: i32) -> (i32, i32) {
    %c0_i32 = arith.constant 0 : i32
    %c0_i32_0 = arith.constant 0 : i32
    %c0_i32_1 = arith.constant 0 : i32
    return %c0_i32, %c0_i32_0 : i32, i32
  }
  func.func @transform_6(%arg0: i32) -> (i32, i32) {
    %c0_i32 = arith.constant 0 : i32
    %c0_i32_0 = arith.constant 0 : i32
    return %arg0, %c0_i32 : i32, i32
  }
  func.func @transform_7(%arg0: i32) -> (i32, i32) {
    %c0_i32 = arith.constant 0 : i32
    %c0_i32_0 = arith.constant 0 : i32
    return %arg0, %c0_i32 : i32, i32
  }
  func.func @transform_8(%arg0: i32) -> (i32, i32) {
    %c0_i32 = arith.constant 0 : i32
    %c0_i32_0 = arith.constant 0 : i32
    return %arg0, %c0_i32 : i32, i32
  }
}

</mosaic_0001>

<bundles_post_ra>
// kernel: tpu_custom_call.1
= control target key start
LH: loop header
LB: loop body
LE: loop exit
PB: predicated region body
PF: predicated region fallthrough
CT: control target
= control target key end

     0   :  { %s571_s0 = inlined_call_operand.hbm [shape: f32[8,48], index: 0, kind: input, shape index: {}]   ;;  %s572_s1 = inlined_call_operand.hbm [shape: f32[8,32], index: 1, kind: input, shape index: {}]   ;;  %s573_s2 = inlined_call_operand.hbm [shape: f32[80,80], index: 2, kind: input, shape index: {}]   ;;  %s574_s3 = inlined_call_operand.vmem [shape: f32[1,80], index: 3, kind: input, shape index: {}]   ;;  %s575_s4 = inlined_call_operand.vmem [shape: f32[1,80], index: 4, kind: input, shape index: {}]   ;;  %s576_s5 = inlined_call_operand.<no memory space> [shape: f32[1,1], index: 5, kind: input, shape index: {}]   ;;  %s577_s6 = inlined_call_operand.hbm [shape: f32[8,48], index: 6, kind: output, shape index: {0}]   ;;  %s578_s7 = inlined_call_operand.hbm [shape: f32[8,32], index: 7, kind: output, shape index: {1}]   ;;  %s579_s8 = inlined_call_operand.vmem [shape: f32[8,1], index: 8, kind: output, shape index: {2}]  }
   0x1   :  { %v14_v0 = vstv %s576_s5 }
   0x2   :  { %15 = vst [vmem:[#allocation2] sm:$0x1] %v14_v0 }
   0x3   :  { %16 = vsyncpa [#allocation4], 0 }
   0x4   :  { %17 = vsyncpa [#allocation7], 0 }
   0x5   :  { %18 = vsyncpa [#allocation5], 0 }
   0x6   :  { %19 = vsyncpa [#allocation11], 0  ;;  %s436_s29 = smov [#allocation6]   ;;  %s437_s9 = smov [#allocation3]  }
   0x7   :  { %s36_s30 = sshll.u32 %s436_s29, 4  ;;  %s26_s10 = sshll.u32 %s437_s9, 4  ;;  %s37_s30 = int_to_ptr.vmem [resolvable:$true] %s36_s30  ;;  %s27_s10 = int_to_ptr.vmem [resolvable:$true] %s26_s10 }
   0x8   :  { %s318_s13 = scalar_lea.hbm %s572_s1, 128 }
   0x9   :  { %p319_p0 = scmp.ne.s32.totalorder %s572_s1, %s318_s13  ;;  %p322_p1 = scmp.lt.u32.totalorder %s318_s13, %s572_s1 }
   0xb   :  { %p324_p2 = pnand %p322_p1, %p319_p0 }
   0xd   :  { %327 = shalt.err (!%p324_p2)
}
   0xe   :  { %s328_s17 = scalar_lea.vmem %s37_s30, 128  ;;  %p333_p4 = scmp.lt.s32.totalorder %s37_s30, %s37_s30 }
   0xf   :  { %p329_p3 = scmp.ne.s32.totalorder %s37_s30, %s328_s17  ;;  %p334_p5 = scmp.lt.s32.totalorder %s328_s17, %s328_s17 }
  0x11   :  { %p335_p6 = por %p334_p5, %p333_p4 }
  0x13   :  { %p336_p7 = pnand %p335_p6, %p329_p3 }
  0x15   :  { %339 = shalt.err (!%p336_p7)
}
  0x16   :  { %39 = dma.hbm_to_vmem [thread:$0]  %s572_s1, 128, %s37_s30, [#allocation7]  }
  0x17   :  { %s340_s22 = scalar_lea.hbm %s571_s0, 128 }
  0x18   :  { %p341_p8 = scmp.ne.s32.totalorder %s571_s0, %s340_s22  ;;  %p344_p9 = scmp.lt.u32.totalorder %s340_s22, %s571_s0 }
  0x1a   :  { %p346_p10 = pnand %p344_p9, %p341_p8 }
  0x1c   :  { %349 = shalt.err (!%p346_p10)
}
  0x1d   :  { %s350_s27 = scalar_lea.vmem %s27_s10, 128  ;;  %p355_p12 = scmp.lt.s32.totalorder %s27_s10, %s27_s10 }
  0x1e   :  { %p351_p11 = scmp.ne.s32.totalorder %s27_s10, %s350_s27  ;;  %p356_p13 = scmp.lt.s32.totalorder %s350_s27, %s350_s27 }
  0x20   :  { %p357_p0 = por %p356_p13, %p355_p12 }
  0x22   :  { %p358_p1 = pnand %p357_p0, %p351_p11 }
  0x24   :  { %361 = shalt.err (!%p358_p1)
}
  0x25   :  { %29 = dma.hbm_to_vmem [thread:$0]  %s571_s0, 128, %s27_s10, [#allocation4]  }
  0x26   :  { %s438_s29 = smov [#allocation8]   ;;  %s362_s12 = scalar_lea.hbm %s573_s2, 1280 }
  0x27   :  { %s45_s30 = sshll.u32 %s438_s29, 4  ;;  %p363_p2 = scmp.ne.s32.totalorder %s573_s2, %s362_s12  ;;  %s46_s30 = int_to_ptr.vmem [resolvable:$true] %s45_s30 }
  0x28   :  { %p366_p3 = scmp.lt.u32.totalorder %s362_s12, %s573_s2 }
  0x2a   :  { %p368_p4 = pnand %p366_p3, %p363_p2 }
  0x2c   :  { %371 = shalt.err (!%p368_p4)
}
  0x2d   :  { %s372_s16 = scalar_lea.vmem %s46_s30, 1280  ;;  %p377_p6 = scmp.lt.s32.totalorder %s46_s30, %s46_s30 }
  0x2e   :  { %p373_p5 = scmp.ne.s32.totalorder %s46_s30, %s372_s16  ;;  %p378_p7 = scmp.lt.s32.totalorder %s372_s16, %s372_s16 }
  0x30   :  { %p379_p8 = por %p378_p7, %p377_p6 }
  0x32   :  { %p380_p9 = pnand %p379_p8, %p373_p5 }
  0x34   :  { %383 = shalt.err (!%p380_p9)
}
  0x35   :  { %s439_s0 = smov 128   ;;  %s440_s10 = smov 8  }
  0x36   :  { %51 = dma.hbm_to_vmem [thread:$0]  %s573_s2, 1280, %s46_s30, [#allocation7], %s439_s0, %s439_s0, %s440_s10  }
  0x37   :  { %428 = dma.done.wait [#allocation4], 128  }
  0x38   :  { %429 = vsyncadd [#allocation4], 4294967168 }
  0x39   :  { %430 = dma.done.wait [#allocation7], 1408  }
  0x3a   :  { %431 = vsyncadd [#allocation7], 4294965888  ;;  %v441_v1 = vmov 0.0|0.0   ;;  %vm442_vm0 = vmmov 0   ;;  %v443_v2 = vmov 0.0   ;;  %v532_v3 = vld [vmem:[#allocation6] sm:$0xff] }
  0x3b   :  { %283 = vmatprep.subr.bf16.mxu0 %v441_v1  ;;  %280 = vmatprep.mubr.msk.f32.mxu0 %vm442_vm0, %v443_v2  ;;  %v75_v4 = vld [vmem:[#allocation8] sm:$0xff]  ;;  %v76_v5 = vld [vmem:[#allocation8 + $0x8] sm:$0xff]  ;;  %s444_s19 = smov 48   ;;  %v77_v7 = vld [vmem:[#allocation8 + $0x10] sm:$0xff]  ;;  %vm73_vm1 = vcmask 392192   ;;  %vm92_vm2 = vcmask 654336  }
  0x3c   :  { %70 = vrot.lane.b32.xlu0 %v532_v3, %s444_s19  ;;  %v284_v6 = vpack.c.bf16 %v76_v5, %v75_v4  ;;  %v78_v8 = vld [vmem:[#allocation8 + $0x18] sm:$0xff]  ;;  %v79_v10 = vld [vmem:[#allocation8 + $0x20] sm:$0xff]  ;;  %v80_v11 = vld [vmem:[#allocation8 + $0x28] sm:$0xff]  ;;  %v445_v30 = vmov 0   ;;  %vm208_vm3 = vcmask 7168   ;;  %s447_s25 = smov [#allocation10]  }
  0x3d   :  { %v287_v9 = vpack.c.bf16 %v78_v8, %v77_v7  ;;  %v290_v12 = vpack.c.bf16 %v80_v11, %v79_v10  ;;  %v81_v13 = vld [vmem:[#allocation8 + $0x30] sm:$0xff]  ;;  %v82_v14 = vld [vmem:[#allocation8 + $0x38] sm:$0xff]  ;;  %v83_v16 = vld [vmem:[#allocation8 + $0x40] sm:$0xff]  ;;  %310 = vset.pattern.permute.xlu1 %v445_v30  ;;  %311 = vset.pattern.permute.xlu0 %v445_v30  ;;  %s226_s26 = sshll.u32 %s447_s25, 4  ;;  %s227_s26 = int_to_ptr.vmem [resolvable:$true] %s226_s26 }
  0x3e   :  { %285 = vmatpush3.bf16.msra.mxu0 %v284_v6  ;;  %v293_v15 = vpack.c.bf16 %v82_v14, %v81_v13  ;;  %v84_v17 = vld [vmem:[#allocation8 + $0x48] sm:$0xff]  ;;  %v67_v19 = vld [vmem:[#allocation3] sm:$0xff] }
  0x3f   :  { %286 = vmatprep.subr.bf16.mxu0 %v441_v1  ;;  %v296_v18 = vpack.c.bf16 %v84_v17, %v83_v16  ;;  %v244_v22 = vld [vmem:[%s574_s3] ss:$0 sm:$0xff] }
  0x40   :  { %v246_v26 = vld [vmem:[%s575_s4] ss:$0 sm:$0xff]  ;;  %s446_s4 = smov [#allocation9]  }
  0x41   :  { %v247_v31 = vld [vmem:[#allocation2] ss:$0 sm:$0xff]  ;;  %s216_s24 = sshll.u32 %s446_s4, 4  ;;  %s217_s24 = int_to_ptr.vmem [resolvable:$true] %s216_s24 }
  0x42   :  { %288 = vmatpush3.bf16.msra.mxu0 %v287_v9  ;;  %s384_s27 = scalar_lea.vmem %s217_s24, 128  ;;  %p389_p11 = scmp.lt.s32.totalorder %s217_s24, %s217_s24 }
  0x43   :  { %289 = vmatprep.subr.bf16.mxu0 %v441_v1  ;;  %p385_p10 = scmp.ne.s32.totalorder %s217_s24, %s384_s27  ;;  %p390_p12 = scmp.lt.s32.totalorder %s384_s27, %s384_s27 }
  0x45   :  { %p391_p13 = por %p390_p12, %p389_p11 }
  0x46   :  { %291 = vmatpush3.bf16.msra.mxu0 %v290_v12 }
  0x47   :  { %292 = vmatprep.subr.bf16.mxu0 %v441_v1  ;;  %p392_p0 = pnand %p391_p13, %p385_p10 }
  0x4a   :  { %294 = vmatpush3.bf16.msra.mxu0 %v293_v15 }
  0x4b   :  { %295 = vmatprep.subr.bf16.mxu0 %v441_v1 }
  0x4e   :  { %297 = vmatpush3.bf16.msra.mxu0 %v296_v18 }
  0xae   :  { %v71_v20 = vpop.permute.xlu0 %70 }
  0xaf   :  { %v74_v21 = vsel %vm73_vm1, %v67_v19, %v71_v20 }
  0xb0   :  { %281 = vmatmul.mubr.msk.f32.vlgmr.msra.gmra.mrb[0].mxu0 %vm92_vm2, %v74_v21 }
 0x183   :  { %v162_v23 = vpop.f32.mrb[0].mxu0 }
 0x184   :  { %v163_v24 = vadd.f32 %v244_v22, %v162_v23  ;;  %v282_v25 = vpop.f32.mrb[1].mxu0 }
 0x186   :  { %312 = vtanh.f32 %v163_v24 }
 0x190   :  { %v313_v27 = vpop.eup %312 }
 0x191   :  { %v174_v28 = vmul.f32 %v313_v27, %v246_v26 }
 0x193   :  { %v175_v29 = vsel %vm92_vm2, %v174_v28, 0.0 }
 0x194   :  { %176 = vadd.xlane.f32.xlu0 %v175_v29 }
 0x221   :  { %v177_v32 = vpop.xlane.xlu0 %176 }
 0x222   :  { %v185_v33 = vadd.f32 %v247_v31, %v177_v32 }
 0x224   :  { %v248_v34 = vmul.f32 -1.442695, %v185_v33 }
 0x226   :  { %314 = vpow2.f32 %v248_v34 }
 0x230   :  { %v315_v35 = vpop.eup %314 }
 0x231   :  { %v189_v36 = vadd.f32 1.0, %v315_v35 }
 0x233   :  { %316 = vrcp.f32 %v189_v36 }
 0x23d   :  { %v317_v37 = vpop.eup %316 }
 0x23e   :  { %209 = vst.msk [vmem:[%s579_s8] sm:$0xff] %vm208_vm3, %v317_v37  ;;  %195 = vperm.xlu1 %310, %v317_v37   ;;  %v192_v38 = vsub.f32 1.0, %v317_v37 }
 0x242   :  { %202 = vperm.xlu1 %310, %v192_v38  }
 0x2bd   :  { %v196_v39 = vpop.permute.xlu1 %195 }
 0x2be   :  { %v198_v40 = vmul.f32 %v196_v39, %v67_v19 }
 0x2c0   :  { %199 = vst.msk [vmem:[#allocation9] sm:$0xff] %vm73_vm1, %v198_v40 }
 0x2c1   :  { %v203_v41 = vpop.permute.xlu1 %202 }
 0x2c2   :  { %395 = shalt.err (!%p392_p0)
}
 0x2c3   :  { %s396_s28 = scalar_lea.hbm %s577_s6, 128 }
 0x2c4   :  { %p397_p1 = scmp.ne.s32.totalorder %s577_s6, %s396_s28  ;;  %p400_p2 = scmp.lt.u32.totalorder %s396_s28, %s577_s6 }
 0x2c6   :  { %p402_p3 = pnand %p400_p2, %p397_p1 }
 0x2c8   :  { %405 = shalt.err (!%p402_p3)
}
 0x2c9   :  { %219 = dma.vmem_to_hbm [thread:$0]  %s217_s24, 128, %s577_s6, [#allocation5]   ;;  %vm206_vm4 = vcmask 261120   ;;  %v205_v42 = vmul.f32 %v203_v41, %v532_v3 }
 0x2ca   :  { %s406_s14 = scalar_lea.vmem %s227_s26, 128  ;;  %p411_p5 = scmp.lt.s32.totalorder %s227_s26, %s227_s26 }
 0x2cb   :  { %207 = vst.msk [vmem:[#allocation10] sm:$0xff] %vm206_vm4, %v205_v42  ;;  %p407_p4 = scmp.ne.s32.totalorder %s227_s26, %s406_s14  ;;  %p412_p6 = scmp.lt.s32.totalorder %s406_s14, %s406_s14 }
 0x2cd   :  { %p413_p7 = por %p412_p6, %p411_p5 }
 0x2cf   :  { %p414_p8 = pnand %p413_p7, %p407_p4 }
 0x2d1   :  { %417 = shalt.err (!%p414_p8)
}
 0x2d2   :  { %s418_s16 = scalar_lea.hbm %s578_s7, 128 }
 0x2d3   :  { %p419_p9 = scmp.ne.s32.totalorder %s578_s7, %s418_s16  ;;  %p422_p10 = scmp.lt.u32.totalorder %s418_s16, %s578_s7 }
 0x2d5   :  { %p424_p11 = pnand %p422_p10, %p419_p9 }
 0x2d7   :  { %427 = shalt.err (!%p424_p11)
}
 0x2d8   :  { %229 = dma.vmem_to_hbm [thread:$0]  %s227_s26, 128, %s578_s7, [#allocation11]  }
 0x2d9   :  { %432 = dma.done.wait [#allocation5], 128  }
 0x2da   :  { %433 = vsyncadd [#allocation5], 4294967168 }
 0x2db   :  { %434 = dma.done.wait [#allocation11], 128  }
 0x2dc   :  { %435 = vsyncadd [#allocation11], 4294967168 }
 0x2dd   :  { %240 = vsyncpa [#allocation4], 1 }
 0x2de   :  { %241 = vsyncpa [#allocation7], 1 }
 0x2df   :  { %242 = vsyncpa [#allocation5], 1 }
 0x2e0   :  { %243 = vsyncpa [#allocation11], 1 }

</bundles_post_ra>
